<compile_context>
chip_gen: v6e
topology: v6e:2x2x1
jax: 0.10.0
libtpu: 0.0.40
codegen_flags: <defaults>
</compile_context>

<pallas_src>
import functools
import math

import jax
import jax.numpy as jnp
from jax.experimental import pallas as pl
from jax.experimental.pallas import tpu as pltpu

_LANE = 128     # vreg lane width / MXU minor dim
_SUBLANE = 8    # vreg sublane count


def _round_up(n, m):
    return ((n + m - 1) // m) * m


def _mlp_kernel(*refs, n_layers, use_tanh, negative_slope):
    # refs = (x_ref, w0, b0, w1, b1, ..., w_{L-1}, b_{L-1}, out_ref)
    x_ref = refs[0]
    out_ref = refs[-1]
    param_refs = refs[1:-1]

    compute_dtype = x_ref.dtype
    h = x_ref[...]                                    # (TB, in_p) compute dtype
    for i in range(n_layers):
        w = param_refs[2 * i][...]                    # (in_p, out_p) compute dtype
        b = param_refs[2 * i + 1][...]                # (1, out_p)   float32
        acc = jnp.dot(h, w, preferred_element_type=jnp.float32) + b
        if i < n_layers - 1:
            # LeakyReLU (PyTorch default slope 0.01): max(x, slope*x)
            acc = jnp.maximum(acc, negative_slope * acc)
            h = acc.astype(compute_dtype)             # back to MXU input dtype
        else:
            h = acc                                   # keep fp32 for final cast
    if use_tanh:
        h = jnp.tanh(h)
    out_ref[...] = h.astype(out_ref.dtype)


def basic_fully_connected_net(x, params, use_tanh=False,
                              compute_dtype=jnp.float32, batch_tile=128):
    """Fused MLP forward in a single Pallas kernel.

    x:      (batch, dim)
    params: list of (W, b) with W shape (in, out), b shape (1, out)
            (W is pre-transposed vs. PyTorch, i.e. y = x @ W + b)
    """
    n_layers = len(params)
    batch, dim = x.shape
    out_dim = params[-1][0].shape[1]

    # ---- pad shapes to lane/sublane-friendly sizes -------------------------
    dims = [dim] + [w.shape[1] for (w, _) in params]          # [in, h1, ..., out]
    dims_p = [_round_up(d, _LANE) for d in dims]

    tb = min(batch_tile, _round_up(batch, _SUBLANE))
    tb = _round_up(tb, _SUBLANE)
    batch_p = _round_up(batch, tb)
    n_tiles = batch_p // tb

    x_p = jnp.zeros((batch_p, dims_p[0]), compute_dtype)
    x_p = x_p.at[:batch, :dim].set(x.astype(compute_dtype))

    flat_params = []
    param_specs = []
    weight_bytes = 0
    for i, (w, b) in enumerate(params):
        in_p, out_p = dims_p[i], dims_p[i + 1]
        w_p = jnp.zeros((in_p, out_p), compute_dtype)
        w_p = w_p.at[:w.shape[0], :w.shape[1]].set(w.astype(compute_dtype))
        b_p = jnp.zeros((1, out_p), jnp.float32)
        b_p = b_p.at[:, :b.shape[-1]].set(b.reshape(1, -1).astype(jnp.float32))
        flat_params += [w_p, b_p]
        # Grid-invariant blocks: constant index keeps weights VMEM-resident
        # across batch tiles (no re-DMA per grid step).
        param_specs += [pl.BlockSpec((in_p, out_p), lambda i: (0, 0)),
                        pl.BlockSpec((1, out_p), lambda i: (0, 0))]
        weight_bytes += (w_p.size * w_p.dtype.itemsize
                         + b_p.size * b_p.dtype.itemsize)

    # ---- cost estimate & VMEM budget ---------------------------------------
    flops = 2 * batch_p * sum(dims_p[i] * dims_p[i + 1] for i in range(n_layers))
    transcendentals = batch_p * dims_p[-1] if use_tanh else 0
    cdt_size = x_p.dtype.itemsize
    out_dt_size = x.dtype.itemsize
    io_bytes = (x_p.size * cdt_size
                + weight_bytes
                + batch_p * dims_p[-1] * out_dt_size)
    cost = pl.CostEstimate(flops=flops, transcendentals=transcendentals,
                           bytes_accessed=io_bytes)

    # double-buffered x / out tiles + resident weight stack + headroom
    tile_bytes = 2 * tb * (dims_p[0] * cdt_size + dims_p[-1] * out_dt_size)
    vmem_limit = max(32 * 1024 * 1024, int(weight_bytes + tile_bytes + (4 << 20)))

    kernel = functools.partial(_mlp_kernel, n_layers=n_layers,
                               use_tanh=use_tanh, negative_slope=0.01)

    out_p = pl.pallas_call(
        kernel,
        grid=(n_tiles,),
        in_specs=[pl.BlockSpec((tb, dims_p[0]), lambda i: (i, 0))] + param_specs,
        out_specs=pl.BlockSpec((tb, dims_p[-1]), lambda i: (i, 0)),
        out_shape=jax.ShapeDtypeStruct((batch_p, dims_p[-1]), x.dtype),
        compiler_params=pltpu.CompilerParams(
            dimension_semantics=("parallel",),     # shards batch tiles over TCs
            vmem_limit_bytes=vmem_limit,
        ),
        cost_estimate=cost,
    )(x_p, *flat_params)

    return out_p[:batch, :out_dim]


def init_params(key, dim, depth, hidden_dim, out_dim=None):
    """Deterministic init mimicking PyTorch nn.Linear defaults
    (uniform(-1/sqrt(fan_in), 1/sqrt(fan_in)) for both W and b)."""
    out_dim = dim if out_dim is None else out_dim
    sizes = [(dim, hidden_dim)]
    for _ in range(depth):
        sizes.append((hidden_dim, hidden_dim))
    sizes.append((hidden_dim, out_dim))

    params = []
    for (fan_in, fan_out) in sizes:
        key, kw, kb = jax.random.split(key, 3)
        bound = 1.0 / math.sqrt(fan_in)
        w = jax.random.uniform(kw, (fan_in, fan_out), jnp.float32, -bound, bound)
        b = jax.random.uniform(kb, (1, fan_out), jnp.float32, -bound, bound)
        params.append((w, b))
    return params


def reference_forward(x, params, use_tanh=False):
    h = x
    n = len(params)
    for i, (w, b) in enumerate(params):
        h = h @ w + b
        if i < n - 1:
            h = jnp.where(h >= 0, h, 0.01 * h)
    if use_tanh:
        h = jnp.tanh(h)
    return h


if __name__ == "__main__":
    # Small shapes consistent with the module: batch=2, dim=4, hidden=32, depth=2.
    dim, depth, hidden_dim = 4, 2, 32
    batch = 2

    key = jax.random.PRNGKey(0)
    key, kx = jax.random.split(key)
    x = jax.random.normal(kx, (batch, dim), jnp.float32)

    params = init_params(key, dim, depth, hidden_dim, out_dim=None)

    # fp32 compute path: zero padding is exact, so this matches the reference.
    out = basic_fully_connected_net(x, params, use_tanh=False)
    out = jax.block_until_ready(out)

    ref = reference_forward(x, params, use_tanh=False)
    assert out.shape == (batch, dim), out.shape
    assert jnp.allclose(out, ref, atol=1e-5, rtol=1e-5), (out, ref)

    # bf16 MXU-input path (fp32 accumulation): exercised for shape/finiteness.
    out_bf16 = basic_fully_connected_net(x, params, use_tanh=True,
                                         compute_dtype=jnp.bfloat16)
    out_bf16 = jax.block_until_ready(out_bf16)
    assert out_bf16.shape == (batch, dim), out_bf16.shape
    assert bool(jnp.all(jnp.isfinite(out_bf16)))

    print("KERNEL_OK")
</pallas_src>

<mosaic_0001>
module attributes {stable_mosaic.version = 11 : i64} {
  func.func @_mlp_kernel(%arg0: i32, %arg1: memref<8x128xf32, #tpu.memory_space<vmem>>, %arg2: memref<128x128xf32, #tpu.memory_space<vmem>>, %arg3: memref<1x128xf32, #tpu.memory_space<vmem>>, %arg4: memref<128x128xf32, #tpu.memory_space<vmem>>, %arg5: memref<1x128xf32, #tpu.memory_space<vmem>>, %arg6: memref<128x128xf32, #tpu.memory_space<vmem>>, %arg7: memref<1x128xf32, #tpu.memory_space<vmem>>, %arg8: memref<128x128xf32, #tpu.memory_space<vmem>>, %arg9: memref<1x128xf32, #tpu.memory_space<vmem>>, %arg10: memref<8x128xf32, #tpu.memory_space<vmem>>) attributes {dimension_semantics = [#tpu.dimension_semantics<parallel>], iteration_bounds = array<i64: 1>, scalar_prefetch = 0 : i64, scratch_operands = 0 : i64, tpu.core_type = #tpu.core_type<tc>, window_params = [{transform_indices = @transform_0, window_bounds = array<i64: 8, 128>}, {pipeline_mode = #tpu.pipeline_mode<synchronous>, transform_indices = @transform_1, window_bounds = array<i64: 128, 128>}, {pipeline_mode = #tpu.pipeline_mode<synchronous>, transform_indices = @transform_2, window_bounds = array<i64: 1, 128>}, {pipeline_mode = #tpu.pipeline_mode<synchronous>, transform_indices = @transform_3, window_bounds = array<i64: 128, 128>}, {pipeline_mode = #tpu.pipeline_mode<synchronous>, transform_indices = @transform_4, window_bounds = array<i64: 1, 128>}, {pipeline_mode = #tpu.pipeline_mode<synchronous>, transform_indices = @transform_5, window_bounds = array<i64: 128, 128>}, {pipeline_mode = #tpu.pipeline_mode<synchronous>, transform_indices = @transform_6, window_bounds = array<i64: 1, 128>}, {pipeline_mode = #tpu.pipeline_mode<synchronous>, transform_indices = @transform_7, window_bounds = array<i64: 128, 128>}, {pipeline_mode = #tpu.pipeline_mode<synchronous>, transform_indices = @transform_8, window_bounds = array<i64: 1, 128>}, {transform_indices = @transform_9, window_bounds = array<i64: 8, 128>}]} {
    %c0 = arith.constant 0 : index
    %c0_0 = arith.constant 0 : index
    %0 = vector.load %arg1[%c0, %c0_0] : memref<8x128xf32, #tpu.memory_space<vmem>>, vector<8x128xf32>
    %c0_1 = arith.constant 0 : index
    %c0_2 = arith.constant 0 : index
    %1 = vector.load %arg2[%c0_1, %c0_2] : memref<128x128xf32, #tpu.memory_space<vmem>>, vector<128x128xf32>
    %c0_3 = arith.constant 0 : index
    %c0_4 = arith.constant 0 : index
    %2 = vector.load %arg3[%c0_3, %c0_4] : memref<1x128xf32, #tpu.memory_space<vmem>>, vector<1x128xf32>
    %cst = arith.constant dense<0.000000e+00> : vector<8x128xf32>
    %3 = tpu.matmul %0, %1, %cst {dimension_numbers = #tpu.dot_dimension_numbers<[1], [0], [0], [1], [0, 0, 1, 1], [], []>} : vector<8x128xf32>, vector<128x128xf32>, vector<8x128xf32> -> vector<8x128xf32>
    %4 = vector.broadcast %2 : vector<1x128xf32> to vector<8x128xf32>
    %5 = arith.addf %3, %4 : vector<8x128xf32>
    %cst_5 = arith.constant 0.00999999977 : f32
    %6 = vector.broadcast %cst_5 : f32 to vector<8x128xf32>
    %7 = arith.mulf %6, %5 : vector<8x128xf32>
    %8 = arith.maximumf %5, %7 : vector<8x128xf32>
    %c0_6 = arith.constant 0 : index
    %c0_7 = arith.constant 0 : index
    %9 = vector.load %arg4[%c0_6, %c0_7] : memref<128x128xf32, #tpu.memory_space<vmem>>, vector<128x128xf32>
    %c0_8 = arith.constant 0 : index
    %c0_9 = arith.constant 0 : index
    %10 = vector.load %arg5[%c0_8, %c0_9] : memref<1x128xf32, #tpu.memory_space<vmem>>, vector<1x128xf32>
    %cst_10 = arith.constant dense<0.000000e+00> : vector<8x128xf32>
    %11 = tpu.matmul %8, %9, %cst_10 {dimension_numbers = #tpu.dot_dimension_numbers<[1], [0], [0], [1], [0, 0, 1, 1], [], []>} : vector<8x128xf32>, vector<128x128xf32>, vector<8x128xf32> -> vector<8x128xf32>
    %12 = vector.broadcast %10 : vector<1x128xf32> to vector<8x128xf32>
    %13 = arith.addf %11, %12 : vector<8x128xf32>
    %cst_11 = arith.constant 0.00999999977 : f32
    %14 = vector.broadcast %cst_11 : f32 to vector<8x128xf32>
    %15 = arith.mulf %14, %13 : vector<8x128xf32>
    %16 = arith.maximumf %13, %15 : vector<8x128xf32>
    %c0_12 = arith.constant 0 : index
    %c0_13 = arith.constant 0 : index
    %17 = vector.load %arg6[%c0_12, %c0_13] : memref<128x128xf32, #tpu.memory_space<vmem>>, vector<128x128xf32>
    %c0_14 = arith.constant 0 : index
    %c0_15 = arith.constant 0 : index
    %18 = vector.load %arg7[%c0_14, %c0_15] : memref<1x128xf32, #tpu.memory_space<vmem>>, vector<1x128xf32>
    %cst_16 = arith.constant dense<0.000000e+00> : vector<8x128xf32>
    %19 = tpu.matmul %16, %17, %cst_16 {dimension_numbers = #tpu.dot_dimension_numbers<[1], [0], [0], [1], [0, 0, 1, 1], [], []>} : vector<8x128xf32>, vector<128x128xf32>, vector<8x128xf32> -> vector<8x128xf32>
    %20 = vector.broadcast %18 : vector<1x128xf32> to vector<8x128xf32>
    %21 = arith.addf %19, %20 : vector<8x128xf32>
    %cst_17 = arith.constant 0.00999999977 : f32
    %22 = vector.broadcast %cst_17 : f32 to vector<8x128xf32>
    %23 = arith.mulf %22, %21 : vector<8x128xf32>
    %24 = arith.maximumf %21, %23 : vector<8x128xf32>
    %c0_18 = arith.constant 0 : index
    %c0_19 = arith.constant 0 : index
    %25 = vector.load %arg8[%c0_18, %c0_19] : memref<128x128xf32, #tpu.memory_space<vmem>>, vector<128x128xf32>
    %c0_20 = arith.constant 0 : index
    %c0_21 = arith.constant 0 : index
    %26 = vector.load %arg9[%c0_20, %c0_21] : memref<1x128xf32, #tpu.memory_space<vmem>>, vector<1x128xf32>
    %cst_22 = arith.constant dense<0.000000e+00> : vector<8x128xf32>
    %27 = tpu.matmul %24, %25, %cst_22 {dimension_numbers = #tpu.dot_dimension_numbers<[1], [0], [0], [1], [0, 0, 1, 1], [], []>} : vector<8x128xf32>, vector<128x128xf32>, vector<8x128xf32> -> vector<8x128xf32>
    %28 = vector.broadcast %26 : vector<1x128xf32> to vector<8x128xf32>
    %29 = arith.addf %27, %28 : vector<8x128xf32>
    %c0_23 = arith.constant 0 : index
    %c0_24 = arith.constant 0 : index
    %30 = vector.load %arg10[%c0_23, %c0_24] : memref<8x128xf32, #tpu.memory_space<vmem>>, vector<8x128xf32>
    tpu.vector_store %arg10[%c0_23, %c0_24], %29 {strides = array<i32>} : memref<8x128xf32, #tpu.memory_space<vmem>>, vector<8x128xf32>,
    return
  }
  func.func @transform_0(%arg0: i32) -> (i32, i32) {
    %c0_i32 = arith.constant 0 : i32
    %c0_i32_0 = arith.constant 0 : i32
    return %arg0, %c0_i32 : i32, i32
  }
  func.func @transform_1(%arg0: i32) -> (i32, i32) {
    %c0_i32 = arith.constant 0 : i32
    %c0_i32_0 = arith.constant 0 : i32
    %c0_i32_1 = arith.constant 0 : i32
    return %c0_i32, %c0_i32_0 : i32, i32
  }
  func.func @transform_2(%arg0: i32) -> (i32, i32) {
    %c0_i32 = arith.constant 0 : i32
    %c0_i32_0 = arith.constant 0 : i32
    %c0_i32_1 = arith.constant 0 : i32
    return %c0_i32, %c0_i32_0 : i32, i32
  }
  func.func @transform_3(%arg0: i32) -> (i32, i32) {
    %c0_i32 = arith.constant 0 : i32
    %c0_i32_0 = arith.constant 0 : i32
    %c0_i32_1 = arith.constant 0 : i32
    return %c0_i32, %c0_i32_0 : i32, i32
  }
  func.func @transform_4(%arg0: i32) -> (i32, i32) {
    %c0_i32 = arith.constant 0 : i32
    %c0_i32_0 = arith.constant 0 : i32
    %c0_i32_1 = arith.constant 0 : i32
    return %c0_i32, %c0_i32_0 : i32, i32
  }
  func.func @transform_5(%arg0: i32) -> (i32, i32) {
    %c0_i32 = arith.constant 0 : i32
    %c0_i32_0 = arith.constant 0 : i32
    %c0_i32_1 = arith.constant 0 : i32
    return %c0_i32, %c0_i32_0 : i32, i32
  }
  func.func @transform_6(%arg0: i32) -> (i32, i32) {
    %c0_i32 = arith.constant 0 : i32
    %c0_i32_0 = arith.constant 0 : i32
    %c0_i32_1 = arith.constant 0 : i32
    return %c0_i32, %c0_i32_0 : i32, i32
  }
  func.func @transform_7(%arg0: i32) -> (i32, i32) {
    %c0_i32 = arith.constant 0 : i32
    %c0_i32_0 = arith.constant 0 : i32
    %c0_i32_1 = arith.constant 0 : i32
    return %c0_i32, %c0_i32_0 : i32, i32
  }
  func.func @transform_8(%arg0: i32) -> (i32, i32) {
    %c0_i32 = arith.constant 0 : i32
    %c0_i32_0 = arith.constant 0 : i32
    %c0_i32_1 = arith.constant 0 : i32
    return %c0_i32, %c0_i32_0 : i32, i32
  }
  func.func @transform_9(%arg0: i32) -> (i32, i32) {
    %c0_i32 = arith.constant 0 : i32
    %c0_i32_0 = arith.constant 0 : i32
    return %arg0, %c0_i32 : i32, i32
  }
}

</mosaic_0001>

<bundles_post_ra>
// kernel: tpu_custom_call.1
= control target key start
LH: loop header
LB: loop body
LE: loop exit
PB: predicated region body
PF: predicated region fallthrough
CT: control target
= control target key end

     0   :  { %14 = vsyncpa [#allocation3], 0  ;;  %s1020_s0 = inlined_call_operand.hbm [shape: f32[8,128], index: 0, kind: input, shape index: {}]   ;;  %s1021_s1 = inlined_call_operand.hbm [shape: f32[128,128], index: 1, kind: input, shape index: {}]   ;;  %s1022_s2 = inlined_call_operand.vmem [shape: f32[1,128], index: 2, kind: input, shape index: {}]   ;;  %s1023_s3 = inlined_call_operand.hbm [shape: f32[128,128], index: 3, kind: input, shape index: {}]   ;;  %s1024_s4 = inlined_call_operand.vmem [shape: f32[1,128], index: 4, kind: input, shape index: {}]   ;;  %s1025_s5 = inlined_call_operand.hbm [shape: f32[128,128], index: 5, kind: input, shape index: {}]   ;;  %s1026_s6 = inlined_call_operand.vmem [shape: f32[1,128], index: 6, kind: input, shape index: {}]   ;;  %s1027_s7 = inlined_call_operand.hbm [shape: f32[128,128], index: 7, kind: input, shape index: {}]   ;;  %s1028_s8 = inlined_call_operand.vmem [shape: f32[1,128], index: 8, kind: input, shape index: {}]   ;;  %s1029_s9 = inlined_call_operand.hbm [shape: f32[8,128], index: 9, kind: output, shape index: {}]  }
   0x1   :  { %15 = vsyncpa [#allocation6], 0 }
   0x2   :  { %16 = vsyncpa [#allocation9], 0 }
   0x3   :  { %17 = vsyncpa [#allocation4], 0  ;;  %s846_s30 = smov [#allocation5]  }
   0x4   :  { %s33_s10 = sshll.u32 %s846_s30, 4  ;;  %s34_s10 = int_to_ptr.vmem [resolvable:$true] %s33_s10 }
   0x5   :  { %s726_s11 = scalar_lea.vmem %s34_s10, 2048  ;;  %p731_p1 = scmp.lt.s32.totalorder %s34_s10, %s34_s10 }
   0x6   :  { %p727_p0 = scmp.ne.s32.totalorder %s34_s10, %s726_s11  ;;  %p732_p2 = scmp.lt.s32.totalorder %s726_s11, %s726_s11 }
   0x8   :  { %p733_p3 = por %p732_p2, %p731_p1 }
   0xa   :  { %p734_p4 = pnand %p733_p3, %p727_p0 }
   0xc   :  { %737 = shalt.err (!%p734_p4)
}
   0xd   :  { %s847_s12 = smov 128   ;;  %s848_s13 = smov 8  }
   0xe   :  { %39 = dma.hbm_to_vmem [thread:$0]  %s1021_s1, 2048, %s34_s10, [#allocation6], %s847_s12, %s847_s12, %s848_s13  }
   0xf   :  { %s849_s16 = smov [#allocation8]   ;;  %s850_s18 = smov [#allocation2]  }
  0x10   :  { %s61_s17 = sshll.u32 %s849_s16, 4  ;;  %s24_s19 = sshll.u32 %s850_s18, 4  ;;  %s62_s17 = int_to_ptr.vmem [resolvable:$true] %s61_s17  ;;  %s25_s19 = int_to_ptr.vmem [resolvable:$true] %s24_s19 }
  0x11   :  { %s746_s20 = scalar_lea.vmem %s62_s17, 2048  ;;  %p751_p6 = scmp.lt.s32.totalorder %s62_s17, %s62_s17 }
  0x12   :  { %p747_p5 = scmp.ne.s32.totalorder %s62_s17, %s746_s20  ;;  %p752_p7 = scmp.lt.s32.totalorder %s746_s20, %s746_s20 }
  0x14   :  { %p753_p8 = por %p752_p7, %p751_p6 }
  0x16   :  { %p754_p9 = pnand %p753_p8, %p747_p5 }
  0x18   :  { %757 = shalt.err (!%p754_p9)
}
  0x19   :  { %67 = dma.hbm_to_vmem [thread:$0]  %s1025_s5, 2048, %s62_s17, [#allocation9], %s847_s12, %s847_s12, %s848_s13  }
  0x1a   :  { %s766_s1 = scalar_lea.vmem %s25_s19, 128  ;;  %p771_p11 = scmp.lt.s32.totalorder %s25_s19, %s25_s19 }
  0x1b   :  { %p767_p10 = scmp.ne.s32.totalorder %s25_s19, %s766_s1  ;;  %p772_p12 = scmp.lt.s32.totalorder %s766_s1, %s766_s1 }
  0x1d   :  { %p773_p13 = por %p772_p12, %p771_p11 }
  0x1f   :  { %p774_p0 = pnand %p773_p13, %p767_p10 }
  0x21   :  { %777 = shalt.err (!%p774_p0)
}
  0x22   :  { %27 = dma.hbm_to_vmem [thread:$0]  %s1020_s0, 128, %s25_s19, [#allocation3]  }
  0x23   :  { %s851_s25 = smov [#allocation7]   ;;  %s852_s27 = smov [#allocation10]  }
  0x24   :  { %s47_s26 = sshll.u32 %s851_s25, 4  ;;  %s75_s28 = sshll.u32 %s852_s27, 4  ;;  %s48_s26 = int_to_ptr.vmem [resolvable:$true] %s47_s26  ;;  %s76_s28 = int_to_ptr.vmem [resolvable:$true] %s75_s28 }
  0x25   :  { %s786_s29 = scalar_lea.vmem %s48_s26, 2048  ;;  %p791_p2 = scmp.lt.s32.totalorder %s48_s26, %s48_s26 }
  0x26   :  { %p787_p1 = scmp.ne.s32.totalorder %s48_s26, %s786_s29  ;;  %p792_p3 = scmp.lt.s32.totalorder %s786_s29, %s786_s29 }
  0x28   :  { %p793_p4 = por %p792_p3, %p791_p2 }
  0x2a   :  { %p794_p5 = pnand %p793_p4, %p787_p1 }
  0x2c   :  { %797 = shalt.err (!%p794_p5)
}
  0x2d   :  { %53 = dma.hbm_to_vmem [thread:$0]  %s1023_s3, 2048, %s48_s26, [#allocation6], %s847_s12, %s847_s12, %s848_s13  }
  0x2e   :  { %s806_s0 = scalar_lea.vmem %s76_s28, 2048  ;;  %p811_p7 = scmp.lt.s32.totalorder %s76_s28, %s76_s28 }
  0x2f   :  { %p807_p6 = scmp.ne.s32.totalorder %s76_s28, %s806_s0  ;;  %p812_p8 = scmp.lt.s32.totalorder %s806_s0, %s806_s0 }
  0x31   :  { %p813_p9 = por %p812_p8, %p811_p7 }
  0x33   :  { %p814_p10 = pnand %p813_p9, %p807_p6 }
  0x35   :  { %817 = shalt.err (!%p814_p10)
}
  0x36   :  { %81 = dma.hbm_to_vmem [thread:$0]  %s1027_s7, 2048, %s76_s28, [#allocation9], %s847_s12, %s847_s12, %s848_s13  }
  0x37   :  { %838 = dma.done.wait [#allocation3], 128  }
  0x38   :  { %839 = vsyncadd [#allocation3], 4294967168 }
  0x39   :  { %840 = dma.done.wait [#allocation6], 4096  }
  0x3a   :  { %841 = vsyncadd [#allocation6], 4294963200 }
  0x3b   :  { %842 = dma.done.wait [#allocation9], 4096  }
  0x3c   :  { %843 = vsyncadd [#allocation9], 4294963200  ;;  %v853_v0 = vmov 0.0   ;;  %vm854_vm0 = vmmov 0   ;;  %v115_v1 = vld [vmem:[#allocation5 + $0x78] sm:$0xff]  ;;  %v114_v2 = vld [vmem:[#allocation5 + $0x70] sm:$0xff] }
  0x3d   :  { %568 = vmatprep.subr.mxu0 %v853_v0  ;;  %600 = vmatprep.mubr.msk.f32.mxu0 %vm854_vm0, %v853_v0  ;;  %v113_v3 = vld [vmem:[#allocation5 + $0x68] sm:$0xff]  ;;  %v112_v4 = vld [vmem:[#allocation5 + $0x60] sm:$0xff]  ;;  %v210_v5 = vld [vmem:[#allocation7 + $0x78] sm:$0xff]  ;;  %s855_s16 = smov [#allocation11]  }
  0x3e   :  { %603 = vmatprep.subr.mxu1 %v853_v0  ;;  %635 = vmatprep.mubr.msk.f32.mxu1 %vm854_vm0, %v853_v0  ;;  %v111_v6 = vld [vmem:[#allocation5 + $0x58] sm:$0xff]  ;;  %v209_v7 = vld [vmem:[#allocation7 + $0x70] sm:$0xff]  ;;  %v208_v8 = vld [vmem:[#allocation7 + $0x68] sm:$0xff]  ;;  %s485_s17 = sshll.u32 %s855_s16, 4  ;;  %s486_s17 = int_to_ptr.vmem [resolvable:$true] %s485_s17 }
  0x3f   :  { %569 = vmatpush3.msra.mxu0 %v115_v1  ;;  %604 = vmatpush3.msra.mxu1 %v210_v5  ;;  %v110_v9 = vld [vmem:[#allocation5 + $0x50] sm:$0xff]  ;;  %v207_v10 = vld [vmem:[#allocation7 + $0x60] sm:$0xff]  ;;  %v109_v11 = vld [vmem:[#allocation5 + $0x48] sm:$0xff]  ;;  %s818_s18 = scalar_lea.vmem %s486_s17, 128  ;;  %p823_p12 = scmp.lt.s32.totalorder %s486_s17, %s486_s17 }
  0x40   :  { %570 = vmatprep.subr.mxu0 %v853_v0  ;;  %605 = vmatprep.subr.mxu1 %v853_v0  ;;  %v206_v12 = vld [vmem:[#allocation7 + $0x58] sm:$0xff]  ;;  %v108_v13 = vld [vmem:[#allocation5 + $0x40] sm:$0xff]  ;;  %v205_v14 = vld [vmem:[#allocation7 + $0x50] sm:$0xff]  ;;  %p819_p11 = scmp.ne.s32.totalorder %s486_s17, %s818_s18  ;;  %p824_p13 = scmp.lt.s32.totalorder %s818_s18, %s818_s18 }
  0x41   :  { %571 = vmatpush3.msra.mxu0 %v114_v2  ;;  %606 = vmatpush3.msra.mxu1 %v209_v7  ;;  %v107_v15 = vld [vmem:[#allocation5 + $0x38] sm:$0xff]  ;;  %v204_v16 = vld [vmem:[#allocation7 + $0x48] sm:$0xff]  ;;  %v106_v17 = vld [vmem:[#allocation5 + $0x30] sm:$0xff] }
  0x42   :  { %572 = vmatprep.subr.mxu0 %v853_v0  ;;  %607 = vmatprep.subr.mxu1 %v853_v0  ;;  %v203_v18 = vld [vmem:[#allocation7 + $0x40] sm:$0xff]  ;;  %v105_v19 = vld [vmem:[#allocation5 + $0x28] sm:$0xff]  ;;  %v202_v20 = vld [vmem:[#allocation7 + $0x38] sm:$0xff]  ;;  %p825_p0 = por %p824_p13, %p823_p12 }
  0x43   :  { %573 = vmatpush3.msra.mxu0 %v113_v3  ;;  %608 = vmatpush3.msra.mxu1 %v208_v8  ;;  %v104_v21 = vld [vmem:[#allocation5 + $0x20] sm:$0xff]  ;;  %v201_v22 = vld [vmem:[#allocation7 + $0x30] sm:$0xff]  ;;  %v103_v23 = vld [vmem:[#allocation5 + $0x18] sm:$0xff] }
  0x44   :  { %574 = vmatprep.subr.mxu0 %v853_v0  ;;  %609 = vmatprep.subr.mxu1 %v853_v0  ;;  %v200_v24 = vld [vmem:[#allocation7 + $0x28] sm:$0xff]  ;;  %v102_v25 = vld [vmem:[#allocation5 + $0x10] sm:$0xff]  ;;  %v199_v26 = vld [vmem:[#allocation7 + $0x20] sm:$0xff]  ;;  %p826_p1 = pnand %p825_p0, %p819_p11 }
  0x45   :  { %575 = vmatpush3.msra.mxu0 %v112_v4  ;;  %610 = vmatpush3.msra.mxu1 %v207_v10  ;;  %v101_v27 = vld [vmem:[#allocation5 + $0x8] sm:$0xff]  ;;  %v100_v28 = vld [vmem:[#allocation5] sm:$0xff]  ;;  %v99_v29 = vld [vmem:[#allocation2] sm:$0xff] }
  0x46   :  { %576 = vmatprep.subr.mxu0 %v853_v0  ;;  %611 = vmatprep.subr.mxu1 %v853_v0  ;;  %v198_v30 = vld [vmem:[#allocation7 + $0x18] sm:$0xff]  ;;  %v197_v31 = vld [vmem:[#allocation7 + $0x10] sm:$0xff]  ;;  %v196_v32 = vld [vmem:[#allocation7 + $0x8] sm:$0xff] }
  0x47   :  { %577 = vmatpush3.msra.mxu0 %v111_v6  ;;  %612 = vmatpush3.msra.mxu1 %v206_v12  ;;  %v195_v33 = vld [vmem:[#allocation7] sm:$0xff]  ;;  %v305_v34 = vld [vmem:[#allocation8 + $0x78] sm:$0xff]  ;;  %v304_v35 = vld [vmem:[#allocation8 + $0x70] sm:$0xff] }
  0x48   :  { %578 = vmatprep.subr.mxu0 %v853_v0  ;;  %613 = vmatprep.subr.mxu1 %v853_v0  ;;  %v303_v36 = vld [vmem:[#allocation8 + $0x68] sm:$0xff]  ;;  %v302_v37 = vld [vmem:[#allocation8 + $0x60] sm:$0xff]  ;;  %v301_v38 = vld [vmem:[#allocation8 + $0x58] sm:$0xff] }
  0x49   :  { %579 = vmatpush3.msra.mxu0 %v110_v9  ;;  %614 = vmatpush3.msra.mxu1 %v205_v14  ;;  %v300_v39 = vld [vmem:[#allocation8 + $0x50] sm:$0xff]  ;;  %v299_v40 = vld [vmem:[#allocation8 + $0x48] sm:$0xff]  ;;  %v298_v41 = vld [vmem:[#allocation8 + $0x40] sm:$0xff] }
  0x4a   :  { %580 = vmatprep.subr.mxu0 %v853_v0  ;;  %615 = vmatprep.subr.mxu1 %v853_v0  ;;  %v297_v42 = vld [vmem:[#allocation8 + $0x38] sm:$0xff]  ;;  %v296_v43 = vld [vmem:[#allocation8 + $0x30] sm:$0xff]  ;;  %v295_v44 = vld [vmem:[#allocation8 + $0x28] sm:$0xff] }
  0x4b   :  { %581 = vmatpush3.msra.mxu0 %v109_v11  ;;  %616 = vmatpush3.msra.mxu1 %v204_v16  ;;  %v294_v45 = vld [vmem:[#allocation8 + $0x20] sm:$0xff]  ;;  %v496_v46 = vld [vmem:[%s1022_s2] ss:$0 sm:$0xff]  ;;  %v292_v53 = vld [vmem:[#allocation8 + $0x10] sm:$0xff] }
  0x4c   :  { %582 = vmatprep.subr.mxu0 %v853_v0  ;;  %617 = vmatprep.subr.mxu1 %v853_v0  ;;  %v293_v52 = vld [vmem:[#allocation8 + $0x18] sm:$0xff]  ;;  %v291_v54 = vld [vmem:[#allocation8 + $0x8] sm:$0xff]  ;;  %v290_v55 = vld [vmem:[#allocation8] sm:$0xff] }
  0x4d   :  { %583 = vmatpush3.msra.mxu0 %v108_v13  ;;  %618 = vmatpush3.msra.mxu1 %v203_v18  ;;  %v400_v56 = vld [vmem:[#allocation10 + $0x78] sm:$0xff]  ;;  %v399_v57 = vld [vmem:[#allocation10 + $0x70] sm:$0xff]  ;;  %v398_v58 = vld [vmem:[#allocation10 + $0x68] sm:$0xff] }
  0x4e   :  { %584 = vmatprep.subr.mxu0 %v853_v0  ;;  %619 = vmatprep.subr.mxu1 %v853_v0  ;;  %v397_v59 = vld [vmem:[#allocation10 + $0x60] sm:$0xff]  ;;  %v396_v60 = vld [vmem:[#allocation10 + $0x58] sm:$0xff]  ;;  %v395_v61 = vld [vmem:[#allocation10 + $0x50] sm:$0xff] }
  0x4f   :  { %585 = vmatpush3.msra.mxu0 %v107_v15  ;;  %620 = vmatpush3.msra.mxu1 %v202_v20  ;;  %v394_v62 = vld [vmem:[#allocation10 + $0x48] sm:$0xff]  ;;  %v393_v63 = vld [vmem:[#allocation10 + $0x40] sm:$0xff]  ;;  %v392_v1 = vld [vmem:[#allocation10 + $0x38] sm:$0xff] }
  0x50   :  { %586 = vmatprep.subr.mxu0 %v853_v0  ;;  %621 = vmatprep.subr.mxu1 %v853_v0  ;;  %v391_v2 = vld [vmem:[#allocation10 + $0x30] sm:$0xff]  ;;  %v390_v3 = vld [vmem:[#allocation10 + $0x28] sm:$0xff]  ;;  %v389_v4 = vld [vmem:[#allocation10 + $0x20] sm:$0xff] }
  0x51   :  { %587 = vmatpush3.msra.mxu0 %v106_v17  ;;  %622 = vmatpush3.msra.mxu1 %v201_v22  ;;  %v497_v5 = vld [vmem:[%s1024_s4] ss:$0 sm:$0xff]  ;;  %v387_v12 = vld [vmem:[#allocation10 + $0x10] sm:$0xff]  ;;  %v386_v13 = vld [vmem:[#allocation10 + $0x8] sm:$0xff] }
  0x52   :  { %588 = vmatprep.subr.mxu0 %v853_v0  ;;  %623 = vmatprep.subr.mxu1 %v853_v0  ;;  %v388_v11 = vld [vmem:[#allocation10 + $0x18] sm:$0xff]  ;;  %v385_v14 = vld [vmem:[#allocation10] sm:$0xff] }
  0x53   :  { %589 = vmatpush3.msra.mxu0 %v105_v19  ;;  %624 = vmatpush3.msra.mxu1 %v200_v24  ;;  %v498_v15 = vld [vmem:[%s1026_s6] ss:$0 sm:$0xff] }
  0x54   :  { %590 = vmatprep.subr.mxu0 %v853_v0  ;;  %625 = vmatprep.subr.mxu1 %v853_v0 }
  0x55   :  { %591 = vmatpush3.msra.mxu0 %v104_v21  ;;  %626 = vmatpush3.msra.mxu1 %v199_v26  ;;  %v499_v21 = vld [vmem:[%s1028_s8] ss:$0 sm:$0xff] }
  0x56   :  { %592 = vmatprep.subr.mxu0 %v853_v0  ;;  %627 = vmatprep.subr.mxu1 %v853_v0 }
  0x57   :  { %593 = vmatpush3.msra.mxu0 %v103_v23  ;;  %628 = vmatpush3.msra.mxu1 %v198_v30 }
  0x58   :  { %594 = vmatprep.subr.mxu0 %v853_v0  ;;  %629 = vmatprep.subr.mxu1 %v853_v0 }
  0x59   :  { %595 = vmatpush3.msra.mxu0 %v102_v25  ;;  %630 = vmatpush3.msra.mxu1 %v197_v31 }
  0x5a   :  { %596 = vmatprep.subr.mxu0 %v853_v0  ;;  %631 = vmatprep.subr.mxu1 %v853_v0 }
  0x5b   :  { %597 = vmatpush3.msra.mxu0 %v101_v27  ;;  %632 = vmatpush3.msra.mxu1 %v196_v32 }
  0x5c   :  { %598 = vmatprep.subr.mxu0 %v853_v0  ;;  %633 = vmatprep.subr.mxu1 %v853_v0 }
  0x5d   :  { %599 = vmatpush3.msra.mxu0 %v100_v28  ;;  %634 = vmatpush3.msra.mxu1 %v195_v33 }
  0x5e   :  { %601 = vmatmul.mubr.f32.vlgmr.msra.gmra.mxu0 %v99_v29  ;;  %638 = vmatprep.subr.mxu0 %v853_v0 }
  0x5f   :  { %670 = vmatprep.mubr.msk.f32.mxu0 %vm854_vm0, %v853_v0  ;;  %673 = vmatprep.subr.mxu1 %v853_v0 }
  0x60   :  { %639 = vmatpush3.msra.mxu0 %v305_v34 }
  0x61   :  { %640 = vmatprep.subr.mxu0 %v853_v0 }
  0x62   :  { %641 = vmatpush3.msra.mxu0 %v304_v35 }
  0x63   :  { %642 = vmatprep.subr.mxu0 %v853_v0 }
  0x64   :  { %643 = vmatpush3.msra.mxu0 %v303_v36 }
  0x65   :  { %644 = vmatprep.subr.mxu0 %v853_v0 }
  0x66   :  { %645 = vmatpush3.msra.mxu0 %v302_v37 }
  0x67   :  { %646 = vmatprep.subr.mxu0 %v853_v0 }
  0x68   :  { %647 = vmatpush3.msra.mxu0 %v301_v38 }
  0x69   :  { %648 = vmatprep.subr.mxu0 %v853_v0 }
  0x6a   :  { %649 = vmatpush3.msra.mxu0 %v300_v39 }
  0x6b   :  { %650 = vmatprep.subr.mxu0 %v853_v0 }
  0x6c   :  { %651 = vmatpush3.msra.mxu0 %v299_v40 }
  0x6d   :  { %652 = vmatprep.subr.mxu0 %v853_v0 }
  0x6e   :  { %653 = vmatpush3.msra.mxu0 %v298_v41 }
  0x6f   :  { %654 = vmatprep.subr.mxu0 %v853_v0 }
  0x70   :  { %655 = vmatpush3.msra.mxu0 %v297_v42 }
  0x71   :  { %656 = vmatprep.subr.mxu0 %v853_v0 }
  0x72   :  { %657 = vmatpush3.msra.mxu0 %v296_v43 }
  0x73   :  { %658 = vmatprep.subr.mxu0 %v853_v0 }
  0x74   :  { %659 = vmatpush3.msra.mxu0 %v295_v44 }
  0x75   :  { %660 = vmatprep.subr.mxu0 %v853_v0 }
  0x76   :  { %661 = vmatpush3.msra.mxu0 %v294_v45 }
  0x77   :  { %662 = vmatprep.subr.mxu0 %v853_v0 }
  0x78   :  { %663 = vmatpush3.msra.mxu0 %v293_v52 }
  0x79   :  { %664 = vmatprep.subr.mxu0 %v853_v0 }
  0x7a   :  { %665 = vmatpush3.msra.mxu0 %v292_v53 }
  0x7b   :  { %666 = vmatprep.subr.mxu0 %v853_v0 }
  0x7c   :  { %667 = vmatpush3.msra.mxu0 %v291_v54 }
  0x7d   :  { %668 = vmatprep.subr.mxu0 %v853_v0 }
  0x7e   :  { %669 = vmatpush3.msra.mxu0 %v290_v55 }
 0x11e   :  { %v189_v47 = vpop.f32.mrf.mxu0 }
 0x11f   :  { %v190_v48 = vadd.f32 %v496_v46, %v189_v47 }
 0x120   :  { %v602_v49 = vpop.f32.mrf.mxu0 }
 0x121   :  { %v193_v50 = vmul.f32 0.01, %v190_v48 }
 0x123   :  { %v194_v51 = vmax.f32 %v190_v48, %v193_v50 }
 0x125   :  { %636 = vmatmul.mubr.f32.vlgmr.msra.gmra.mxu1 %v194_v51 }
 0x126   :  { %705 = vmatprep.mubr.msk.f32.mxu1 %vm854_vm0, %v853_v0  ;;  %674 = vmatpush3.msra.mxu1 %v400_v56 }
 0x127   :  { %675 = vmatprep.subr.mxu1 %v853_v0 }
 0x128   :  { %676 = vmatpush3.msra.mxu1 %v399_v57 }
 0x129   :  { %677 = vmatprep.subr.mxu1 %v853_v0 }
 0x12a   :  { %678 = vmatpush3.msra.mxu1 %v398_v58 }
 0x12b   :  { %679 = vmatprep.subr.mxu1 %v853_v0 }
 0x12c   :  { %680 = vmatpush3.msra.mxu1 %v397_v59 }
 0x12d   :  { %681 = vmatprep.subr.mxu1 %v853_v0 }
 0x12e   :  { %682 = vmatpush3.msra.mxu1 %v396_v60 }
 0x12f   :  { %683 = vmatprep.subr.mxu1 %v853_v0 }
 0x130   :  { %684 = vmatpush3.msra.mxu1 %v395_v61 }
 0x131   :  { %685 = vmatprep.subr.mxu1 %v853_v0 }
 0x132   :  { %686 = vmatpush3.msra.mxu1 %v394_v62 }
 0x133   :  { %687 = vmatprep.subr.mxu1 %v853_v0 }
 0x134   :  { %688 = vmatpush3.msra.mxu1 %v393_v63 }
 0x135   :  { %689 = vmatprep.subr.mxu1 %v853_v0 }
 0x136   :  { %690 = vmatpush3.msra.mxu1 %v392_v1 }
 0x137   :  { %691 = vmatprep.subr.mxu1 %v853_v0 }
 0x138   :  { %692 = vmatpush3.msra.mxu1 %v391_v2 }
 0x139   :  { %693 = vmatprep.subr.mxu1 %v853_v0 }
 0x13a   :  { %694 = vmatpush3.msra.mxu1 %v390_v3 }
 0x13b   :  { %695 = vmatprep.subr.mxu1 %v853_v0 }
 0x13c   :  { %696 = vmatpush3.msra.mxu1 %v389_v4 }
 0x13d   :  { %697 = vmatprep.subr.mxu1 %v853_v0 }
 0x13e   :  { %698 = vmatpush3.msra.mxu1 %v388_v11 }
 0x13f   :  { %699 = vmatprep.subr.mxu1 %v853_v0 }
 0x140   :  { %700 = vmatpush3.msra.mxu1 %v387_v12 }
 0x141   :  { %701 = vmatprep.subr.mxu1 %v853_v0 }
 0x142   :  { %702 = vmatpush3.msra.mxu1 %v386_v13 }
 0x143   :  { %703 = vmatprep.subr.mxu1 %v853_v0 }
 0x144   :  { %704 = vmatpush3.msra.mxu1 %v385_v14 }
 0x1e5   :  { %v284_v6 = vpop.f32.mrf.mxu1 }
 0x1e6   :  { %v285_v7 = vadd.f32 %v497_v5, %v284_v6 }
 0x1e7   :  { %v637_v8 = vpop.f32.mrf.mxu1 }
 0x1e8   :  { %v288_v9 = vmul.f32 0.01, %v285_v7 }
 0x1ea   :  { %v289_v10 = vmax.f32 %v285_v7, %v288_v9 }
 0x1ec   :  { %671 = vmatmul.mubr.f32.vlgmr.msra.gmra.mxu0 %v289_v10 }
 0x2ac   :  { %v379_v16 = vpop.f32.mrf.mxu0 }
 0x2ad   :  { %v380_v17 = vadd.f32 %v498_v15, %v379_v16 }
 0x2ae   :  { %v672_v18 = vpop.f32.mrf.mxu0 }
 0x2af   :  { %v383_v19 = vmul.f32 0.01, %v380_v17 }
 0x2b1   :  { %v384_v20 = vmax.f32 %v380_v17, %v383_v19 }
 0x2b3   :  { %706 = vmatmul.mubr.f32.vlgmr.msra.gmra.mxu1 %v384_v20 }
 0x373   :  { %v474_v22 = vpop.f32.mrf.mxu1 }
 0x374   :  { %v475_v0 = vadd.f32 %v499_v21, %v474_v22 }
 0x375   :  { %v707_v23 = vpop.f32.mrf.mxu1 }
 0x376   :  { %478 = vst [vmem:[#allocation11] sm:$0xff] %v475_v0 }
 0x377   :  { %829 = shalt.err (!%p826_p1)
}
 0x378   :  { %488 = dma.vmem_to_hbm [thread:$0]  %s486_s17, 128, %s1029_s9, [#allocation4]  }
 0x379   :  { %844 = dma.done.wait [#allocation4], 128  }
 0x37a   :  { %845 = vsyncadd [#allocation4], 4294967168 }
 0x37b   :  { %492 = vsyncpa [#allocation3], 1 }
 0x37c   :  { %493 = vsyncpa [#allocation6], 1 }
 0x37d   :  { %494 = vsyncpa [#allocation9], 1 }
 0x37e   :  { %495 = vsyncpa [#allocation4], 1 }

</bundles_post_ra>
